<compile_context>
chip_gen: v5e
topology: v5e:2x2
jax: 0.10.0
libtpu: 0.0.40
codegen_flags: <defaults>
</compile_context>

<pallas_src>
import jax
import jax.numpy as jnp
from jax.experimental import pallas as pl
from jax.experimental.pallas import tpu as pltpu


_LANE_CANDIDATES = (8192, 4096, 2048, 1024, 512, 256, 128)
_TARGET_BLOCK_BYTES = 4 * 1024 * 1024    # ~4 MiB input blocks (mem-bound roofline)
_MIN_VMEM_LIMIT = 16 * 1024 * 1024
_MAX_VMEM_LIMIT = 48 * 1024 * 1024


def _affine_kernel(w_ref, b_ref, x_ref, o_ref):
    # w_ref / b_ref: shape-(1,) f32 scalars in SMEM.  x_ref / o_ref: VMEM tiles.
    w = w_ref[0]
    b = b_ref[0]
    # f32 compute matches PyTorch's promotion of (f32 scalar param) * input.
    o_ref[...] = (w * x_ref[...].astype(jnp.float32) + b).astype(o_ref.dtype)


def _round_up(v, m):
    return ((v + m - 1) // m) * m


def _num_tensorcores():
    # v7x has 2 TensorCores per chip; v5e/v6e have 1.
    try:
        kind = jax.devices()[0].device_kind.lower()
    except Exception:
        return 1
    return 2 if "v7" in kind else 1


def _affine_2d(x2d, weight_f32, bias_f32, out_dtype):
    """Run the Pallas kernel on a lane-dense (rows, lanes) view."""
    rows, lanes = x2d.shape
    in_itemsize = jnp.dtype(x2d.dtype).itemsize
    out_itemsize = jnp.dtype(out_dtype).itemsize
    num_tc = _num_tensorcores()

    # Sublane granularity for the block (8 for 32-bit, 16 for bf16, ...).
    sub = max(8, 32 // in_itemsize)

    if rows <= sub:
        tile_rows = rows  # full-dim block (exempt from the (8,128) rule)
    else:
        max_tile_rows = max(sub, (_TARGET_BLOCK_BYTES // (lanes * in_itemsize)) // sub * sub)
        if num_tc > 1:
            # Force >= num_tc grid steps only where they can be sharded across cores.
            target = _round_up(pl.cdiv(rows, num_tc), sub)
        else:
            # Single TC: the grid is a serial loop -> take the biggest block.
            target = rows if rows % sub == 0 else (rows // sub) * sub
        tile_rows = min(max_tile_rows, max(sub, target))
    grid = (pl.cdiv(rows, tile_rows),)

    in_block = tile_rows * lanes * in_itemsize
    out_block = tile_rows * lanes * out_itemsize
    vmem_limit = int(min(_MAX_VMEM_LIMIT,
                         max(_MIN_VMEM_LIMIT, 2 * (in_block + out_block) + (4 << 20))))

    cost = pl.CostEstimate(
        flops=2 * rows * lanes,
        transcendentals=0,
        bytes_accessed=rows * lanes * (in_itemsize + out_itemsize),
    )

    core_parallel = getattr(pltpu, "CORE_PARALLEL", None)
    if num_tc > 1 and core_parallel is not None and grid[0] % num_tc == 0:
        semantics = (core_parallel,)
    else:
        semantics = ("parallel",)

    def _call(dim_sems):
        return pl.pallas_call(
            _affine_kernel,
            out_shape=jax.ShapeDtypeStruct((rows, lanes), out_dtype),
            grid_spec=pl.GridSpec(
                grid=grid,
                in_specs=[
                    pl.BlockSpec(memory_space=pltpu.SMEM),               # weight (1,)
                    pl.BlockSpec(memory_space=pltpu.SMEM),               # bias   (1,)
                    pl.BlockSpec((tile_rows, lanes), lambda i: (i, 0)),  # x tile
                ],
                out_specs=pl.BlockSpec((tile_rows, lanes), lambda i: (i, 0)),
            ),
            compiler_params=pltpu.CompilerParams(
                dimension_semantics=dim_sems,
                vmem_limit_bytes=vmem_limit,
            ),
            cost_estimate=cost,
        )(weight_f32, bias_f32, x2d)

    try:
        return _call(semantics)
    except Exception:
        # CORE_PARALLEL is a v7x-only codegen path; fall back if it is rejected.
        if semantics == ("parallel",):
            raise
        return _call(("parallel",))


def linear_regression_forward(x, weight, bias):
    """y = weight * x + bias elementwise; weight / bias have shape (1,)."""
    orig_shape = x.shape
    n = x.size
    # PyTorch promotes the f32 (1,)-parameter against the input dtype.
    out_dtype = jnp.promote_types(x.dtype, weight.dtype)

    w32 = weight.astype(jnp.float32)
    b32 = bias.astype(jnp.float32)

    x_flat = jnp.reshape(x, (-1,))
    rem = n % 128
    main_n = n - rem

    if main_n == 0:
        # Tiny (<128-elem) tensor: plain XLA is cheaper than a kernel launch.
        y_flat = (w32[0] * x_flat.astype(jnp.float32) + b32[0]).astype(out_dtype)
        return jnp.reshape(y_flat, orig_shape)

    # Aligned prefix goes through the kernel (no whole-tensor pad copy).
    x_main = x_flat if rem == 0 else x_flat[:main_n]

    # Widest lane count (multiple of 128) that divides the aligned prefix.
    for lanes in _LANE_CANDIDATES:
        if main_n % lanes == 0:
            break
    rows = main_n // lanes
    x2d = jnp.reshape(x_main, (rows, lanes))

    out2d = _affine_2d(x2d, w32, b32, out_dtype)

    if rem == 0:
        return jnp.reshape(out2d, orig_shape)

    # Ragged tail (< 128 elements): trivial XLA epilogue instead of pad+slice.
    y_tail = (w32[0] * x_flat[main_n:].astype(jnp.float32) + b32[0]).astype(out_dtype)
    y_flat = jnp.concatenate([jnp.reshape(out2d, (-1,)), y_tail])
    return jnp.reshape(y_flat, orig_shape)


if __name__ == "__main__":
    key = jax.random.PRNGKey(0)
    k_w, k_b, k_x, k_x2, k_x3 = jax.random.split(key, 5)

    # Deterministic "parameters" (torch.randn(1) analog), shape (1,) each.
    weight = jax.random.normal(k_w, (1,), dtype=jnp.float32)
    bias = jax.random.normal(k_b, (1,), dtype=jnp.float32)

    # Primary small NCHW example: 2*4*16*16 = 2048 elements (single wide block).
    x = jax.random.normal(k_x, (2, 4, 16, 16), dtype=jnp.float32)
    y = jax.block_until_ready(linear_regression_forward(x, weight, bias))
    y_ref = weight[0] * x + bias[0]
    assert y.shape == x.shape
    assert y.dtype == jnp.float32
    assert jnp.allclose(y, y_ref, atol=1e-6), "mismatch vs reference (primary)"

    # Larger shape: exercises the multi-row / big-block path.
    x2 = jax.random.normal(k_x2, (4, 8, 64, 64), dtype=jnp.float32)
    y2 = jax.block_until_ready(linear_regression_forward(x2, weight, bias))
    assert jnp.allclose(y2, weight[0] * x2 + bias[0], atol=1e-6), "mismatch (large)"

    # Odd element count: exercises the ragged prefix+tail path (no pad copy).
    x3 = jax.random.normal(k_x3, (3, 5, 7, 11), dtype=jnp.float32)
    y3 = jax.block_until_ready(linear_regression_forward(x3, weight, bias))
    assert jnp.allclose(y3, weight[0] * x3 + bias[0], atol=1e-6), "mismatch (odd)"

    print("KERNEL_OK")
</pallas_src>

<mosaic_0001>
module attributes {stable_mosaic.version = 11 : i64} {
  func.func @_affine_kernel(%arg0: i32, %arg1: memref<1xf32, #tpu.memory_space<smem>>, %arg2: memref<1xf32, #tpu.memory_space<smem>>, %arg3: memref<1x2048xf32, #tpu.memory_space<vmem>>, %arg4: memref<1x2048xf32, #tpu.memory_space<vmem>>) attributes {dimension_semantics = [#tpu.dimension_semantics<parallel>], iteration_bounds = array<i64: 1>, scalar_prefetch = 0 : i64, scratch_operands = 0 : i64, tpu.core_type = #tpu.core_type<tc>, window_params = [{transform_indices = @transform_0, window_bounds = array<i64: 1>}, {transform_indices = @transform_1, window_bounds = array<i64: 1>}, {transform_indices = @transform_2, window_bounds = array<i64: 1, 2048>}, {transform_indices = @transform_3, window_bounds = array<i64: 1, 2048>}]} {
    %c0 = arith.constant 0 : index
    %0 = memref.load %arg1[%c0] : memref<1xf32, #tpu.memory_space<smem>>
    %c0_0 = arith.constant 0 : index
    %1 = memref.load %arg2[%c0_0] : memref<1xf32, #tpu.memory_space<smem>>
    %c0_1 = arith.constant 0 : index
    %c0_2 = arith.constant 0 : index
    %2 = vector.load %arg3[%c0_1, %c0_2] : memref<1x2048xf32, #tpu.memory_space<vmem>>, vector<1x2048xf32>
    %3 = vector.broadcast %0 : f32 to vector<1x2048xf32>
    %4 = arith.mulf %3, %2 : vector<1x2048xf32>
    %5 = vector.broadcast %1 : f32 to vector<1x2048xf32>
    %6 = arith.addf %4, %5 : vector<1x2048xf32>
    %c0_3 = arith.constant 0 : index
    %c0_4 = arith.constant 0 : index
    %7 = vector.load %arg4[%c0_3, %c0_4] : memref<1x2048xf32, #tpu.memory_space<vmem>>, vector<1x2048xf32>
    tpu.vector_store %arg4[%c0_3, %c0_4], %6 {strides = array<i32>} : memref<1x2048xf32, #tpu.memory_space<vmem>>, vector<1x2048xf32>,
    return
  }
  func.func @transform_0(%arg0: i32) -> i32 {
    %c0_i32 = arith.constant 0 : i32
    %c0_i32_0 = arith.constant 0 : i32
    return %c0_i32 : i32
  }
  func.func @transform_1(%arg0: i32) -> i32 {
    %c0_i32 = arith.constant 0 : i32
    %c0_i32_0 = arith.constant 0 : i32
    return %c0_i32 : i32
  }
  func.func @transform_2(%arg0: i32) -> (i32, i32) {
    %c0_i32 = arith.constant 0 : i32
    %c0_i32_0 = arith.constant 0 : i32
    return %arg0, %c0_i32 : i32, i32
  }
  func.func @transform_3(%arg0: i32) -> (i32, i32) {
    %c0_i32 = arith.constant 0 : i32
    %c0_i32_0 = arith.constant 0 : i32
    return %arg0, %c0_i32 : i32, i32
  }
}

</mosaic_0001>

<bundles_post_ra>
// kernel: tpu_custom_call.1
= control target key start
LH: loop header
LB: loop body
LE: loop exit
PB: predicated region body
PF: predicated region fallthrough
CT: control target
= control target key end

     0   :  { %10 = vsyncpa [#allocation5], 0  ;;  %s148_s0 = inlined_call_operand.<no memory space> [shape: f32[1], index: 0, kind: input, shape index: {}]   ;;  %s149_s1 = inlined_call_operand.<no memory space> [shape: f32[1], index: 1, kind: input, shape index: {}]   ;;  %s150_s2 = inlined_call_operand.hbm [shape: f32[1,2048], index: 2, kind: input, shape index: {}]   ;;  %s151_s3 = inlined_call_operand.hbm [shape: f32[1,2048], index: 3, kind: output, shape index: {}]  }
   0x1   :  { %11 = vsyncpa [#allocation6], 0  ;;  %s21_s14 = sshll.u32 %s150_s2, 4  ;;  %s114_s15 = smov [#allocation4]   ;;  %s22_s14 = int_to_ptr.hbm [resolvable:$true] %s21_s14 }
   0x2   :  { %s23_s16 = sshll.u32 %s114_s15, 4  ;;  %s24_s16 = int_to_ptr.vmem [resolvable:$true] %s23_s16 }
   0x3   :  { %26 = dma.hbm_to_vmem [thread:$0]  %s22_s14, 256, %s24_s16, [#allocation5]  }
   0x4   :  { %110 = dma.done.wait [#allocation5], 256  }
   0x5   :  { %111 = vsyncadd [#allocation5], 4294967040  ;;  %v35_v0 = vstv %s148_s0  ;;  %v33_v1 = vld [vmem:[#allocation4] sm:$0xff]  ;;  %v38_v2 = vstv %s149_s1  ;;  %v34_v3 = vld [vmem:[#allocation4 + $0x8] sm:$0xff]  ;;  %s115_s2 = smov [#allocation7]   ;;  %s50_s24 = sshll.u32 %s151_s3, 4  ;;  %s51_s24 = int_to_ptr.hbm [resolvable:$true] %s50_s24 }
   0x6   :  { %v36_v4 = vmul.f32 %v35_v0, %v33_v1  ;;  %v37_v5 = vmul.f32 %v35_v0, %v34_v3  ;;  %s48_s21 = sshll.u32 %s115_s2, 4  ;;  %s49_s21 = int_to_ptr.vmem [resolvable:$true] %s48_s21 }
   0x8   :  { %v39_v6 = vadd.f32 %v38_v2, %v36_v4  ;;  %v40_v7 = vadd.f32 %v38_v2, %v37_v5 }
   0xa   :  { %41 = vst [vmem:[#allocation7] sm:$0xff] %v39_v6 }
   0xb   :  { %42 = vst [vmem:[#allocation7 + $0x8] sm:$0xff] %v40_v7 }
   0xc   :  { %53 = dma.vmem_to_hbm [thread:$0]  %s49_s21, 256, %s51_s24, [#allocation6]  }
   0xd   :  { %112 = dma.done.wait [#allocation6], 256  }
   0xe   :  { %113 = vsyncadd [#allocation6], 4294967040 }
   0xf   :  { %58 = vsyncpa [#allocation5], 1 }
  0x10   :  { %59 = vsyncpa [#allocation6], 1 }

</bundles_post_ra>
